<compile_context>
chip_gen: v6e
topology: v6e:2x2x1
jax: 0.10.0
libtpu: 0.0.40
codegen_flags: <defaults>
</compile_context>

<pallas_src>
import functools

import jax
import jax.numpy as jnp
from jax import lax
from jax.experimental import pallas as pl
from jax.experimental.pallas import tpu as pltpu


def _round_up(x, m):
    return (x + m - 1) // m * m


def colen_kernel(sen_ref, mot_ref,
                 wt_ref, bt_ref,          # text_proj       -> lanes [0, H)
                 wm_ref, bm_ref,          # motion_proj/T   -> lanes [H, 2H)
                 w1_ref, b1_ref,          # regressor[0]    -> hidden lanes [0, H)
                 w2_ref, b2_ref,          # regressor[3]    -> lane 2H
                 out_ref):
    # F.normalize(x) = x / max(||x||, eps), eps = 1e-12, implemented as
    # x * rsqrt(max(sumsq, eps^2)). rsqrt runs on the EUP (own VLIW slot); the divide
    # becomes a cheap VPU multiply. Zero lanes stay exactly zero.
    eps_sq = 1e-24

    def mm(x, w_ref):
        # Cast lhs to the (possibly bf16) weight dtype; accumulate in f32 on the MXU.
        return jnp.dot(x.astype(w_ref.dtype), w_ref[...],
                       preferred_element_type=jnp.float32)

    # ---- text branch: text_emb = text_proj(sen_emb), real lanes [0, H) -------
    sen = sen_ref[...]                                            # (Bb, Dt)
    text_emb = mm(sen, wt_ref) + bt_ref[...]                      # (Bb, W) f32
    t_ss = jnp.sum(text_emb * text_emb, axis=-1, keepdims=True)
    text_norm = text_emb * lax.rsqrt(jnp.maximum(t_ss, eps_sq))

    # ---- motion branch: fused time-mean + projection, real lanes [H, 2H) -----
    # wm_ref = tile(wm, (T, 1)) / T, so (B, T*Dm) @ wm_ref == motion_proj(mean_t(x)).
    mot = mot_ref[...]                                            # (Bb, T*Dm)
    motion_emb = mm(mot, wm_ref) + bm_ref[...]                    # (Bb, W) f32
    m_ss = jnp.sum(motion_emb * motion_emb, axis=-1, keepdims=True)
    motion_norm = motion_emb * lax.rsqrt(jnp.maximum(m_ss, eps_sq))

    # ---- length regressor: Linear -> ReLU -> (Dropout=id) -> Linear ----------
    # Uses the pre-normalization text_emb (zero rows of w1 kill the padded lanes).
    h = jnp.maximum(mm(text_emb, w1_ref) + b1_ref[...], 0.0)      # (Bb, H_pad)
    length = mm(h, w2_ref) + b2_ref[...]                          # (Bb, W), lane 2H

    # Branch results live in disjoint lane ranges -> one unmasked lane-dense store.
    out_ref[...] = text_norm + motion_norm + length


def colen_net_forward(sen_emb, motion_feat, params, *,
                      block_b=None, compute_dtype=jnp.float32, interpret=False):
    B, Dt = sen_emb.shape
    Bm, T, Dm = motion_feat.shape
    assert Bm == B
    H = params["wt"].shape[1]

    f32 = jnp.float32
    SUB = 8
    K_mot = T * Dm                                  # fused motion contraction dim
    # Packed output slab: lanes [0,H)=text_norm, [H,2H)=motion_norm, lane 2H=length.
    out_w = max(128, _round_up(2 * H + 1, 128))
    H_pad = _round_up(H, 128)                       # in-vreg hidden width for regressor

    # ---- batch tile: multiple of 8 sublanes (or full B when B < 8) -----------
    if block_b is None:
        if B <= SUB:
            block_b = B                              # full-dim block, no padding at all
        else:
            row_bytes = 4 * (Dt + K_mot + out_w)     # f32 bytes/row in one buffer
            budget = 12 << 20                        # per-buffer budget (fits v7x VMEM
            bb = max(SUB, min(2048, budget // max(row_bytes, 1)))  # with 2x buffering)
            if B >= 2 * SUB:                         # >=2 grid steps -> both v7x cores
                bb = min(bb, _round_up(pl.cdiv(B, 2), SUB))
            block_b = max(SUB, min(bb, (B // SUB) * SUB))
    else:
        block_b = B if B <= SUB else max(SUB, min(_round_up(block_b, SUB),
                                                  (B // SUB) * SUB))
    nb = pl.cdiv(B, block_b)

    # ---- activations: no HBM padding; reshape motion to lane-dense 2-D -------
    sen = sen_emb.astype(f32)
    mot2d = motion_feat.astype(f32).reshape(B, K_mot)   # contiguous -> free reshape

    # ---- weights/biases placed into disjoint lane ranges of the output slab --
    def place(w, rows, cols, row_off, col_off, dtype=f32):
        z = jnp.zeros((rows, cols), f32)
        z = z.at[row_off:row_off + w.shape[0], col_off:col_off + w.shape[1]].set(
            w.astype(f32))
        return z.astype(dtype)

    wm_fused = jnp.tile(params["wm"].astype(f32), (T, 1)) / T      # (T*Dm, H)

    wt = place(params["wt"], Dt, out_w, 0, 0, compute_dtype)       # lanes [0, H)
    bt = place(params["bt"], 1, out_w, 0, 0)
    wm = place(wm_fused, K_mot, out_w, 0, H, compute_dtype)        # lanes [H, 2H)
    bm = place(params["bm"], 1, out_w, 0, H)
    w1 = place(params["w1"], out_w, H_pad, 0, 0, compute_dtype)    # hidden lanes [0, H)
    b1 = place(params["b1"], 1, H_pad, 0, 0)
    w2 = place(params["w2"], H_pad, out_w, 0, 2 * H, compute_dtype)  # lane 2H
    b2 = place(params["b2"], 1, out_w, 0, 2 * H)

    def const_spec(shape):
        # Weights/biases: constant index_map -> VMEM-resident across the B grid.
        nd = len(shape)
        return pl.BlockSpec(shape, lambda i, _nd=nd: (0,) * _nd)

    in_specs = [
        pl.BlockSpec((block_b, Dt), lambda i: (i, 0)),             # sen_emb
        pl.BlockSpec((block_b, K_mot), lambda i: (i, 0)),          # motion (B, T*Dm)
        const_spec((Dt, out_w)), const_spec((1, out_w)),           # text_proj
        const_spec((K_mot, out_w)), const_spec((1, out_w)),        # motion_proj (fused)
        const_spec((out_w, H_pad)), const_spec((1, H_pad)),        # regressor[0]
        const_spec((H_pad, out_w)), const_spec((1, out_w)),        # regressor[3]
    ]
    out_specs = pl.BlockSpec((block_b, out_w), lambda i: (i, 0))
    out_shape = jax.ShapeDtypeStruct((B, out_w), f32)

    # advisory cost estimate for XLA's scheduler
    flops = 2 * B * out_w * (Dt + K_mot + 2 * H_pad)
    weight_bytes = 4 * (Dt * out_w + K_mot * out_w + 2 * out_w * H_pad
                        + 3 * out_w + H_pad)
    bytes_accessed = 4 * (B * Dt + B * K_mot) + weight_bytes + 4 * B * out_w
    cost = pl.CostEstimate(flops=int(flops), transcendentals=int(2 * B),
                           bytes_accessed=int(bytes_accessed))

    # explicit VMEM budget: double-buffered tiles + weights, capped well under the
    # v7x 64 MiB per-TensorCore VMEM to leave headroom for Mosaic scratch.
    tile_bytes = 4 * block_b * (Dt + K_mot + out_w)
    vmem_limit = int(min(48 << 20,
                         max(4 << 20, 2.5 * tile_bytes + 2 * weight_bytes)))

    out = pl.pallas_call(
        colen_kernel,
        grid=(nb,),
        in_specs=in_specs,
        out_specs=out_specs,
        out_shape=out_shape,
        compiler_params=pltpu.CompilerParams(
            dimension_semantics=("parallel",),
            vmem_limit_bytes=vmem_limit),
        cost_estimate=cost,
        interpret=interpret,
    )(sen, mot2d, wt, bt, wm, bm, w1, b1, w2, b2)

    # unpack the single lane-dense slab
    text_norm = out[:, :H]
    motion_norm = out[:, H:2 * H]
    length = out[:, 2 * H]
    return text_norm, motion_norm, length


def init_params(key, text_embed_dim, motion_embed_dim, hidden_dim):
    ks = jax.random.split(key, 8)

    def lin(kw, kb, fan_in, fan_out):
        # deterministic init, (in, out) layout
        w = jax.random.normal(kw, (fan_in, fan_out), jnp.float32) * (1.0 / jnp.sqrt(fan_in))
        b = jax.random.normal(kb, (1, fan_out), jnp.float32) * 0.01
        return w, b

    wt, bt = lin(ks[0], ks[1], text_embed_dim, hidden_dim)     # text_proj
    wm, bm = lin(ks[2], ks[3], motion_embed_dim, hidden_dim)   # motion_proj
    w1, b1 = lin(ks[4], ks[5], hidden_dim, hidden_dim)         # length_regressor[0]
    w2, b2 = lin(ks[6], ks[7], hidden_dim, 1)                  # length_regressor[3]
    return dict(wt=wt, bt=bt, wm=wm, bm=bm, w1=w1, b1=b1, w2=w2, b2=b2)


if __name__ == "__main__":
    # small shapes consistent with the module's forward
    B, T = 2, 8
    text_embed_dim, motion_embed_dim, hidden_dim = 64, 48, 32

    key = jax.random.PRNGKey(0)
    k_sen, k_mot, k_par = jax.random.split(key, 3)

    sen_emb = jax.random.normal(k_sen, (B, text_embed_dim), jnp.float32)
    motion_feat = jax.random.normal(k_mot, (B, T, motion_embed_dim), jnp.float32)
    params = init_params(k_par, text_embed_dim, motion_embed_dim, hidden_dim)

    fwd = jax.jit(functools.partial(colen_net_forward))
    text_norm, motion_norm, length_pred = fwd(sen_emb, motion_feat, params)
    jax.block_until_ready((text_norm, motion_norm, length_pred))

    # pure-JAX reference check (same math as the PyTorch eval forward)
    def ref(sen, mot, p):
        te = sen @ p["wt"] + p["bt"]
        tn = te / jnp.maximum(jnp.linalg.norm(te, axis=-1, keepdims=True), 1e-12)
        me = mot.mean(axis=1) @ p["wm"] + p["bm"]
        mn = me / jnp.maximum(jnp.linalg.norm(me, axis=-1, keepdims=True), 1e-12)
        h = jnp.maximum(te @ p["w1"] + p["b1"], 0.0)
        lp = (h @ p["w2"] + p["b2"])[:, 0]
        return tn, mn, lp

    rt, rm, rl = ref(sen_emb, motion_feat, params)
    assert jnp.allclose(text_norm, rt, atol=1e-5), "text_emb_norm mismatch"
    assert jnp.allclose(motion_norm, rm, atol=1e-5), "motion_emb_norm mismatch"
    assert jnp.allclose(length_pred, rl, atol=1e-5), "length_pred mismatch"
    assert text_norm.shape == (B, hidden_dim)
    assert motion_norm.shape == (B, hidden_dim)
    assert length_pred.shape == (B,)

    # TODO(synk): the `use_ours=True` branch (nn.MultiheadAttention cross-attn over
    # word/pos embeddings, PositionalEncoding, LayerNorm pooling) is not exercised by
    # the default constructor and is not implemented here.
    print("KERNEL_OK")
</pallas_src>

<mosaic_0001>
module attributes {stable_mosaic.version = 11 : i64} {
  func.func @colen_kernel(%arg0: i32, %arg1: memref<2x64xf32, #tpu.memory_space<vmem>>, %arg2: memref<2x384xf32, #tpu.memory_space<vmem>>, %arg3: memref<64x128xf32, #tpu.memory_space<vmem>>, %arg4: memref<1x128xf32, #tpu.memory_space<vmem>>, %arg5: memref<384x128xf32, #tpu.memory_space<vmem>>, %arg6: memref<1x128xf32, #tpu.memory_space<vmem>>, %arg7: memref<128x128xf32, #tpu.memory_space<vmem>>, %arg8: memref<1x128xf32, #tpu.memory_space<vmem>>, %arg9: memref<128x128xf32, #tpu.memory_space<vmem>>, %arg10: memref<1x128xf32, #tpu.memory_space<vmem>>, %arg11: memref<2x128xf32, #tpu.memory_space<vmem>>) attributes {dimension_semantics = [#tpu.dimension_semantics<parallel>], iteration_bounds = array<i64: 1>, scalar_prefetch = 0 : i64, scratch_operands = 0 : i64, tpu.core_type = #tpu.core_type<tc>, window_params = [{transform_indices = @transform_0, window_bounds = array<i64: 2, 64>}, {transform_indices = @transform_1, window_bounds = array<i64: 2, 384>}, {pipeline_mode = #tpu.pipeline_mode<synchronous>, transform_indices = @transform_2, window_bounds = array<i64: 64, 128>}, {pipeline_mode = #tpu.pipeline_mode<synchronous>, transform_indices = @transform_3, window_bounds = array<i64: 1, 128>}, {pipeline_mode = #tpu.pipeline_mode<synchronous>, transform_indices = @transform_4, window_bounds = array<i64: 384, 128>}, {pipeline_mode = #tpu.pipeline_mode<synchronous>, transform_indices = @transform_5, window_bounds = array<i64: 1, 128>}, {pipeline_mode = #tpu.pipeline_mode<synchronous>, transform_indices = @transform_6, window_bounds = array<i64: 128, 128>}, {pipeline_mode = #tpu.pipeline_mode<synchronous>, transform_indices = @transform_7, window_bounds = array<i64: 1, 128>}, {pipeline_mode = #tpu.pipeline_mode<synchronous>, transform_indices = @transform_8, window_bounds = array<i64: 128, 128>}, {pipeline_mode = #tpu.pipeline_mode<synchronous>, transform_indices = @transform_9, window_bounds = array<i64: 1, 128>}, {transform_indices = @transform_10, window_bounds = array<i64: 2, 128>}]} {
    %c0 = arith.constant 0 : index
    %c0_0 = arith.constant 0 : index
    %0 = vector.load %arg1[%c0, %c0_0] : memref<2x64xf32, #tpu.memory_space<vmem>>, vector<2x64xf32>
    %c0_1 = arith.constant 0 : index
    %c0_2 = arith.constant 0 : index
    %1 = vector.load %arg3[%c0_1, %c0_2] : memref<64x128xf32, #tpu.memory_space<vmem>>, vector<64x128xf32>
    %cst = arith.constant dense<0.000000e+00> : vector<2x128xf32>
    %2 = tpu.matmul %0, %1, %cst {dimension_numbers = #tpu.dot_dimension_numbers<[1], [0], [0], [1], [0, 0, 1, 1], [], []>} : vector<2x64xf32>, vector<64x128xf32>, vector<2x128xf32> -> vector<2x128xf32>
    %c0_3 = arith.constant 0 : index
    %c0_4 = arith.constant 0 : index
    %3 = vector.load %arg4[%c0_3, %c0_4] : memref<1x128xf32, #tpu.memory_space<vmem>>, vector<1x128xf32>
    %4 = vector.broadcast %3 : vector<1x128xf32> to vector<2x128xf32>
    %5 = arith.addf %2, %4 : vector<2x128xf32>
    %6 = arith.mulf %5, %5 : vector<2x128xf32>
    %cst_5 = arith.constant dense<0.000000e+00> : vector<2xf32>
    %7 = vector.multi_reduction <add>, %6, %cst_5 [1] : vector<2x128xf32> to vector<2xf32>
    %8 = vector.shape_cast %7 : vector<2xf32> to vector<2x1xf32>
    %cst_6 = arith.constant 1.000000e-24 : f32
    %9 = vector.broadcast %cst_6 : f32 to vector<2x1xf32>
    %10 = arith.maximumf %8, %9 : vector<2x1xf32>
    %11 = math.rsqrt %10 : vector<2x1xf32>
    %12 = vector.broadcast %11 : vector<2x1xf32> to vector<2x128xf32>
    %13 = arith.mulf %5, %12 : vector<2x128xf32>
    %c0_7 = arith.constant 0 : index
    %c0_8 = arith.constant 0 : index
    %14 = vector.load %arg2[%c0_7, %c0_8] : memref<2x384xf32, #tpu.memory_space<vmem>>, vector<2x384xf32>
    %c0_9 = arith.constant 0 : index
    %c0_10 = arith.constant 0 : index
    %15 = vector.load %arg5[%c0_9, %c0_10] : memref<384x128xf32, #tpu.memory_space<vmem>>, vector<384x128xf32>
    %cst_11 = arith.constant dense<0.000000e+00> : vector<2x128xf32>
    %16 = tpu.matmul %14, %15, %cst_11 {dimension_numbers = #tpu.dot_dimension_numbers<[1], [0], [0], [1], [0, 0, 1, 1], [], []>} : vector<2x384xf32>, vector<384x128xf32>, vector<2x128xf32> -> vector<2x128xf32>
    %c0_12 = arith.constant 0 : index
    %c0_13 = arith.constant 0 : index
    %17 = vector.load %arg6[%c0_12, %c0_13] : memref<1x128xf32, #tpu.memory_space<vmem>>, vector<1x128xf32>
    %18 = vector.broadcast %17 : vector<1x128xf32> to vector<2x128xf32>
    %19 = arith.addf %16, %18 : vector<2x128xf32>
    %20 = arith.mulf %19, %19 : vector<2x128xf32>
    %cst_14 = arith.constant dense<0.000000e+00> : vector<2xf32>
    %21 = vector.multi_reduction <add>, %20, %cst_14 [1] : vector<2x128xf32> to vector<2xf32>
    %22 = vector.shape_cast %21 : vector<2xf32> to vector<2x1xf32>
    %cst_15 = arith.constant 1.000000e-24 : f32
    %23 = vector.broadcast %cst_15 : f32 to vector<2x1xf32>
    %24 = arith.maximumf %22, %23 : vector<2x1xf32>
    %25 = math.rsqrt %24 : vector<2x1xf32>
    %26 = vector.broadcast %25 : vector<2x1xf32> to vector<2x128xf32>
    %27 = arith.mulf %19, %26 : vector<2x128xf32>
    %c0_16 = arith.constant 0 : index
    %c0_17 = arith.constant 0 : index
    %28 = vector.load %arg7[%c0_16, %c0_17] : memref<128x128xf32, #tpu.memory_space<vmem>>, vector<128x128xf32>
    %cst_18 = arith.constant dense<0.000000e+00> : vector<2x128xf32>
    %29 = tpu.matmul %5, %28, %cst_18 {dimension_numbers = #tpu.dot_dimension_numbers<[1], [0], [0], [1], [0, 0, 1, 1], [], []>} : vector<2x128xf32>, vector<128x128xf32>, vector<2x128xf32> -> vector<2x128xf32>
    %c0_19 = arith.constant 0 : index
    %c0_20 = arith.constant 0 : index
    %30 = vector.load %arg8[%c0_19, %c0_20] : memref<1x128xf32, #tpu.memory_space<vmem>>, vector<1x128xf32>
    %31 = vector.broadcast %30 : vector<1x128xf32> to vector<2x128xf32>
    %32 = arith.addf %29, %31 : vector<2x128xf32>
    %cst_21 = arith.constant 0.000000e+00 : f32
    %33 = vector.broadcast %cst_21 : f32 to vector<2x128xf32>
    %34 = arith.maximumf %32, %33 : vector<2x128xf32>
    %c0_22 = arith.constant 0 : index
    %c0_23 = arith.constant 0 : index
    %35 = vector.load %arg9[%c0_22, %c0_23] : memref<128x128xf32, #tpu.memory_space<vmem>>, vector<128x128xf32>
    %cst_24 = arith.constant dense<0.000000e+00> : vector<2x128xf32>
    %36 = tpu.matmul %34, %35, %cst_24 {dimension_numbers = #tpu.dot_dimension_numbers<[1], [0], [0], [1], [0, 0, 1, 1], [], []>} : vector<2x128xf32>, vector<128x128xf32>, vector<2x128xf32> -> vector<2x128xf32>
    %c0_25 = arith.constant 0 : index
    %c0_26 = arith.constant 0 : index
    %37 = vector.load %arg10[%c0_25, %c0_26] : memref<1x128xf32, #tpu.memory_space<vmem>>, vector<1x128xf32>
    %38 = vector.broadcast %37 : vector<1x128xf32> to vector<2x128xf32>
    %39 = arith.addf %36, %38 : vector<2x128xf32>
    %40 = arith.addf %13, %27 : vector<2x128xf32>
    %41 = arith.addf %40, %39 : vector<2x128xf32>
    %c0_27 = arith.constant 0 : index
    %c0_28 = arith.constant 0 : index
    %42 = vector.load %arg11[%c0_27, %c0_28] : memref<2x128xf32, #tpu.memory_space<vmem>>, vector<2x128xf32>
    tpu.vector_store %arg11[%c0_27, %c0_28], %41 {strides = array<i32>} : memref<2x128xf32, #tpu.memory_space<vmem>>, vector<2x128xf32>,
    return
  }
  func.func @transform_0(%arg0: i32) -> (i32, i32) {
    %c0_i32 = arith.constant 0 : i32
    %c0_i32_0 = arith.constant 0 : i32
    return %arg0, %c0_i32 : i32, i32
  }
  func.func @transform_1(%arg0: i32) -> (i32, i32) {
    %c0_i32 = arith.constant 0 : i32
    %c0_i32_0 = arith.constant 0 : i32
    return %arg0, %c0_i32 : i32, i32
  }
  func.func @transform_2(%arg0: i32) -> (i32, i32) {
    %c0_i32 = arith.constant 0 : i32
    %c0_i32_0 = arith.constant 0 : i32
    %c0_i32_1 = arith.constant 0 : i32
    return %c0_i32, %c0_i32_0 : i32, i32
  }
  func.func @transform_3(%arg0: i32) -> (i32, i32) {
    %c0_i32 = arith.constant 0 : i32
    %c0_i32_0 = arith.constant 0 : i32
    %c0_i32_1 = arith.constant 0 : i32
    return %c0_i32, %c0_i32_0 : i32, i32
  }
  func.func @transform_4(%arg0: i32) -> (i32, i32) {
    %c0_i32 = arith.constant 0 : i32
    %c0_i32_0 = arith.constant 0 : i32
    %c0_i32_1 = arith.constant 0 : i32
    return %c0_i32, %c0_i32_0 : i32, i32
  }
  func.func @transform_5(%arg0: i32) -> (i32, i32) {
    %c0_i32 = arith.constant 0 : i32
    %c0_i32_0 = arith.constant 0 : i32
    %c0_i32_1 = arith.constant 0 : i32
    return %c0_i32, %c0_i32_0 : i32, i32
  }
  func.func @transform_6(%arg0: i32) -> (i32, i32) {
    %c0_i32 = arith.constant 0 : i32
    %c0_i32_0 = arith.constant 0 : i32
    %c0_i32_1 = arith.constant 0 : i32
    return %c0_i32, %c0_i32_0 : i32, i32
  }
  func.func @transform_7(%arg0: i32) -> (i32, i32) {
    %c0_i32 = arith.constant 0 : i32
    %c0_i32_0 = arith.constant 0 : i32
    %c0_i32_1 = arith.constant 0 : i32
    return %c0_i32, %c0_i32_0 : i32, i32
  }
  func.func @transform_8(%arg0: i32) -> (i32, i32) {
    %c0_i32 = arith.constant 0 : i32
    %c0_i32_0 = arith.constant 0 : i32
    %c0_i32_1 = arith.constant 0 : i32
    return %c0_i32, %c0_i32_0 : i32, i32
  }
  func.func @transform_9(%arg0: i32) -> (i32, i32) {
    %c0_i32 = arith.constant 0 : i32
    %c0_i32_0 = arith.constant 0 : i32
    %c0_i32_1 = arith.constant 0 : i32
    return %c0_i32, %c0_i32_0 : i32, i32
  }
  func.func @transform_10(%arg0: i32) -> (i32, i32) {
    %c0_i32 = arith.constant 0 : i32
    %c0_i32_0 = arith.constant 0 : i32
    return %arg0, %c0_i32 : i32, i32
  }
}

</mosaic_0001>

<bundles_post_ra>
// kernel: colen_net_forward.1
= control target key start
LH: loop header
LB: loop body
LE: loop exit
PB: predicated region body
PF: predicated region fallthrough
CT: control target
= control target key end

     0   :  { %v782_v0 = vmov 0.0   ;;  %vm783_vm0 = vmmov 0   ;;  %vm51_vm1 = vcmask 523264   ;;  %v784_v27 = vmov 1983009808   ;;  %s1206_s2 = inlined_call_operand.vmem [shape: f32[64,128], index: 2, kind: input, shape index: {}]   ;;  %s1207_s4 = inlined_call_operand.vmem [shape: f32[384,128], index: 4, kind: input, shape index: {}]   ;;  %s1208_s0 = inlined_call_operand.vmem [shape: f32[2,64], index: 0, kind: input, shape index: {}]   ;;  %s1209_s1 = inlined_call_operand.vmem [shape: f32[2,384], index: 1, kind: input, shape index: {}]   ;;  %s1210_s6 = inlined_call_operand.vmem [shape: f32[128,128], index: 6, kind: input, shape index: {}]   ;;  %s1211_s3 = inlined_call_operand.vmem [shape: f32[1,128], index: 3, kind: input, shape index: {}]   ;;  %s1212_s8 = inlined_call_operand.vmem [shape: f32[128,128], index: 8, kind: input, shape index: {}]   ;;  %s1213_s5 = inlined_call_operand.vmem [shape: f32[1,128], index: 5, kind: input, shape index: {}]   ;;  %s1214_s7 = inlined_call_operand.vmem [shape: f32[1,128], index: 7, kind: input, shape index: {}]   ;;  %s1215_s9 = inlined_call_operand.vmem [shape: f32[1,128], index: 9, kind: input, shape index: {}]   ;;  %s1216_s10 = inlined_call_operand.vmem [shape: f32[2,128], index: 10, kind: output, shape index: {}]  }
   0x1   :  { %650 = vmatprep.subr.mxu0 %v782_v0  ;;  %v43_v1 = vld [vmem:[%s1206_s2 + $0x38] sm:$0xff]  ;;  %v42_v2 = vld [vmem:[%s1206_s2 + $0x30] sm:$0xff]  ;;  %666 = vmatprep.mubr.msk.f32.mxu0 %vm783_vm0, %v782_v0  ;;  %v41_v4 = vld [vmem:[%s1206_s2 + $0x28] sm:$0xff]  ;;  %v192_v28 = vunpack.c.l.s4 %v784_v27  ;;  %v194_v29 = vlaneseq  ;;  %vm126_vm2 = vcmask 1041408  }
   0x2   :  { %651 = vmatpush3.msra.mxu0 %v43_v1  ;;  %v165_v3 = vld [vmem:[%s1207_s4 + $0xf8] sm:$0xff]  ;;  %v164_v6 = vld [vmem:[%s1207_s4 + $0xf0] sm:$0xff]  ;;  %v163_v8 = vld [vmem:[%s1207_s4 + $0xe8] sm:$0xff] }
   0x3   :  { %652 = vmatprep.subr.mxu0 %v782_v0  ;;  %564 = vmatprep.subr.mxu1 %v165_v3  ;;  %v149_v5 = vld [vmem:[%s1207_s4 + $0x78] sm:$0xff]  ;;  %v148_v7 = vld [vmem:[%s1207_s4 + $0x70] sm:$0xff]  ;;  %v40_v9 = vld [vmem:[%s1206_s2 + $0x20] sm:$0xff]  ;;  %v193_v36 = vunpack.c.0.s8 %v192_v28  ;;  %v195_v37 = vshrl.u32 %v194_v29, 7 }
   0x4   :  { %653 = vmatpush3.msra.mxu0 %v42_v2  ;;  %565 = vmatpush3.msra.mxu1 %v149_v5  ;;  %v147_v10 = vld [vmem:[%s1207_s4 + $0x68] sm:$0xff]  ;;  %v162_v11 = vld [vmem:[%s1207_s4 + $0xe0] sm:$0xff]  ;;  %v39_v12 = vld [vmem:[%s1206_s2 + $0x18] sm:$0xff] }
   0x5   :  { %654 = vmatprep.subr.mxu0 %v782_v0  ;;  %566 = vmatprep.subr.mxu1 %v164_v6  ;;  %v146_v13 = vld [vmem:[%s1207_s4 + $0x60] sm:$0xff]  ;;  %v161_v14 = vld [vmem:[%s1207_s4 + $0xd8] sm:$0xff]  ;;  %v38_v15 = vld [vmem:[%s1206_s2 + $0x10] sm:$0xff]  ;;  %v968_v44 = vsub.s32 %v193_v36, %v195_v37 }
   0x6   :  { %655 = vmatpush3.msra.mxu0 %v41_v4  ;;  %567 = vmatpush3.msra.mxu1 %v148_v7  ;;  %v145_v16 = vld [vmem:[%s1207_s4 + $0x58] sm:$0xff]  ;;  %v160_v17 = vld [vmem:[%s1207_s4 + $0xd0] sm:$0xff]  ;;  %v37_v18 = vld [vmem:[%s1206_s2 + $0x8] sm:$0xff] }
   0x7   :  { %656 = vmatprep.subr.mxu0 %v782_v0  ;;  %568 = vmatprep.subr.mxu1 %v163_v8  ;;  %v144_v19 = vld [vmem:[%s1207_s4 + $0x50] sm:$0xff]  ;;  %v159_v20 = vld [vmem:[%s1207_s4 + $0xc8] sm:$0xff]  ;;  %v36_v21 = vld [vmem:[%s1206_s2] sm:$0xff] }
   0x8   :  { %657 = vmatpush3.msra.mxu0 %v40_v9  ;;  %569 = vmatpush3.msra.mxu1 %v147_v10  ;;  %v143_v22 = vld [vmem:[%s1207_s4 + $0x48] sm:$0xff]  ;;  %v35_v23 = vld [vmem:[%s1208_s0] sm:$0x3]  ;;  %v181_v24 = vld [vmem:[%s1207_s4 + $0x178] sm:$0xff] }
   0x9   :  { %658 = vmatprep.subr.mxu0 %v782_v0  ;;  %570 = vmatprep.subr.mxu1 %v162_v11  ;;  %v158_v25 = vld [vmem:[%s1207_s4 + $0xc0] sm:$0xff]  ;;  %v180_v30 = vld [vmem:[%s1207_s4 + $0x170] sm:$0xff]  ;;  %v157_v31 = vld [vmem:[%s1207_s4 + $0xb8] sm:$0xff] }
   0xa   :  { %659 = vmatpush3.msra.mxu0 %v39_v12  ;;  %571 = vmatpush3.msra.mxu1 %v146_v13  ;;  %v142_v26 = vld [vmem:[%s1207_s4 + $0x40] sm:$0xff]  ;;  %v141_v32 = vld [vmem:[%s1207_s4 + $0x38] sm:$0xff]  ;;  %v179_v33 = vld [vmem:[%s1207_s4 + $0x168] sm:$0xff] }
   0xb   :  { %660 = vmatprep.subr.mxu0 %v782_v0  ;;  %572 = vmatprep.subr.mxu1 %v161_v14  ;;  %v156_v34 = vld [vmem:[%s1207_s4 + $0xb0] sm:$0xff]  ;;  %v178_v38 = vld [vmem:[%s1207_s4 + $0x160] sm:$0xff]  ;;  %v155_v39 = vld [vmem:[%s1207_s4 + $0xa8] sm:$0xff] }
   0xc   :  { %661 = vmatpush3.msra.mxu0 %v38_v15  ;;  %573 = vmatpush3.msra.mxu1 %v145_v16  ;;  %v140_v35 = vld [vmem:[%s1207_s4 + $0x30] sm:$0xff]  ;;  %v139_v40 = vld [vmem:[%s1207_s4 + $0x28] sm:$0xff]  ;;  %v177_v41 = vld [vmem:[%s1207_s4 + $0x158] sm:$0xff] }
   0xd   :  { %662 = vmatprep.subr.mxu0 %v782_v0  ;;  %574 = vmatprep.subr.mxu1 %v160_v17  ;;  %v154_v42 = vld [vmem:[%s1207_s4 + $0xa0] sm:$0xff]  ;;  %v176_v45 = vld [vmem:[%s1207_s4 + $0x150] sm:$0xff]  ;;  %v153_v46 = vld [vmem:[%s1207_s4 + $0x98] sm:$0xff] }
   0xe   :  { %663 = vmatpush3.msra.mxu0 %v37_v18  ;;  %575 = vmatpush3.msra.mxu1 %v144_v19  ;;  %v138_v43 = vld [vmem:[%s1207_s4 + $0x20] sm:$0xff]  ;;  %v137_v48 = vld [vmem:[%s1207_s4 + $0x18] sm:$0xff]  ;;  %v175_v49 = vld [vmem:[%s1207_s4 + $0x148] sm:$0xff] }
   0xf   :  { %664 = vmatprep.subr.mxu0 %v782_v0  ;;  %576 = vmatprep.subr.mxu1 %v159_v20  ;;  %v980_v47 = vld [vmem:[%s1209_s1] sm:$0x3f]  ;;  %v152_v50 = vld [vmem:[%s1207_s4 + $0x90] sm:$0xff]  ;;  %v151_v54 = vld [vmem:[%s1207_s4 + $0x88] sm:$0xff] }
  0x10   :  { %665 = vmatpush3.msra.mxu0 %v36_v21  ;;  %577 = vmatpush3.msra.mxu1 %v143_v22  ;;  %v136_v51 = vld [vmem:[%s1207_s4 + $0x10] sm:$0xff]  ;;  %v197_v52 = vrot.slane %v980_v47, %v968_v44  ;;  %v174_v53 = vld [vmem:[%s1207_s4 + $0x140] sm:$0xff]  ;;  %v135_v55 = vld [vmem:[%s1207_s4 + $0x8] sm:$0xff]  ;;  %v190_v3 = vcombine.high %v980_v47, %v980_v47 }
  0x11   :  { %667 = vmatmul.mubr.msk.f32.vlgmr.msra.gmra.mxu0 %vm51_vm1, %v35_v23  ;;  %669 = vmatprep.subr.mxu0 %v782_v0  ;;  %v173_v56 = vld [vmem:[%s1207_s4 + $0x138] sm:$0xff]  ;;  %v150_v57 = vld [vmem:[%s1207_s4 + $0x80] sm:$0xff]  ;;  %v172_v60 = vld [vmem:[%s1207_s4 + $0x130] sm:$0xff] }
  0x12   :  { %670 = vmatpush3.msra.mxu0 %v181_v24  ;;  %578 = vmatprep.subr.mxu1 %v158_v25  ;;  %v134_v58 = vld [vmem:[%s1207_s4] sm:$0xff]  ;;  %v205_v59 = vcombine.high %v197_v52, %v197_v52  ;;  %v171_v61 = vld [vmem:[%s1207_s4 + $0x128] sm:$0xff]  ;;  %v371_v63 = vld [vmem:[%s1210_s6 + $0x78] sm:$0xff]  ;;  %v204_v8 = vrot.slane %v190_v3, %v968_v44 }
  0x13   :  { %671 = vmatprep.subr.mxu0 %v782_v0  ;;  %579 = vmatpush3.msra.mxu1 %v142_v26  ;;  %v170_v62 = vld [vmem:[%s1207_s4 + $0x120] sm:$0xff]  ;;  %v169_v1 = vld [vmem:[%s1207_s4 + $0x118] sm:$0xff]  ;;  %v370_v2 = vld [vmem:[%s1210_s6 + $0x70] sm:$0xff] }
  0x14   :  { %672 = vmatpush3.msra.mxu0 %v180_v30  ;;  %580 = vmatprep.subr.mxu1 %v157_v31  ;;  %v168_v4 = vld [vmem:[%s1207_s4 + $0x110] sm:$0xff]  ;;  %v369_v5 = vld [vmem:[%s1210_s6 + $0x68] sm:$0xff]  ;;  %v368_v7 = vld [vmem:[%s1210_s6 + $0x60] sm:$0xff] }
  0x15   :  { %673 = vmatprep.subr.mxu0 %v782_v0  ;;  %581 = vmatpush3.msra.mxu1 %v141_v32  ;;  %v167_v6 = vld [vmem:[%s1207_s4 + $0x108] sm:$0xff]  ;;  %v166_v9 = vld [vmem:[%s1207_s4 + $0x100] sm:$0xff]  ;;  %v367_v10 = vld [vmem:[%s1210_s6 + $0x58] sm:$0xff] }
  0x16   :  { %674 = vmatpush3.msra.mxu0 %v179_v33  ;;  %582 = vmatprep.subr.mxu1 %v156_v34  ;;  %v366_v11 = vld [vmem:[%s1210_s6 + $0x50] sm:$0xff]  ;;  %v365_v12 = vld [vmem:[%s1210_s6 + $0x48] sm:$0xff]  ;;  %v364_v13 = vld [vmem:[%s1210_s6 + $0x40] sm:$0xff] }
  0x17   :  { %675 = vmatprep.subr.mxu0 %v782_v0  ;;  %583 = vmatpush3.msra.mxu1 %v140_v35  ;;  %v363_v14 = vld [vmem:[%s1210_s6 + $0x38] sm:$0xff]  ;;  %v362_v15 = vld [vmem:[%s1210_s6 + $0x30] sm:$0xff]  ;;  %v361_v16 = vld [vmem:[%s1210_s6 + $0x28] sm:$0xff] }
  0x18   :  { %676 = vmatpush3.msra.mxu0 %v178_v38  ;;  %584 = vmatprep.subr.mxu1 %v155_v39  ;;  %v360_v17 = vld [vmem:[%s1210_s6 + $0x20] sm:$0xff]  ;;  %v359_v18 = vld [vmem:[%s1210_s6 + $0x18] sm:$0xff]  ;;  %v358_v19 = vld [vmem:[%s1210_s6 + $0x10] sm:$0xff] }
  0x19   :  { %677 = vmatprep.subr.mxu0 %v782_v0  ;;  %585 = vmatpush3.msra.mxu1 %v139_v40  ;;  %v357_v20 = vld [vmem:[%s1210_s6 + $0x8] sm:$0xff]  ;;  %v356_v21 = vld [vmem:[%s1210_s6] sm:$0xff]  ;;  %v465_v28 = vld [vmem:[%s1212_s8 + $0x78] sm:$0xff] }
  0x1a   :  { %678 = vmatpush3.msra.mxu0 %v177_v41  ;;  %586 = vmatprep.subr.mxu1 %v154_v42  ;;  %v550_v22 = vld [vmem:[%s1211_s3] ss:$0 sm:$0xff]  ;;  %v464_v29 = vld [vmem:[%s1212_s8 + $0x70] sm:$0xff]  ;;  %v463_v31 = vld [vmem:[%s1212_s8 + $0x68] sm:$0xff] }
  0x1b   :  { %679 = vmatprep.subr.mxu0 %v782_v0  ;;  %587 = vmatpush3.msra.mxu1 %v138_v43  ;;  %v462_v33 = vld [vmem:[%s1212_s8 + $0x60] sm:$0xff]  ;;  %v461_v42 = vld [vmem:[%s1212_s8 + $0x58] sm:$0xff]  ;;  %v460_v43 = vld [vmem:[%s1212_s8 + $0x50] sm:$0xff] }
  0x1c   :  { %680 = vmatpush3.msra.mxu0 %v176_v45  ;;  %588 = vmatprep.subr.mxu1 %v153_v46  ;;  %v552_v35 = vld [vmem:[%s1213_s5] ss:$0 sm:$0xff]  ;;  %v459_v44 = vld [vmem:[%s1212_s8 + $0x48] sm:$0xff]  ;;  %v457_v46 = vld [vmem:[%s1212_s8 + $0x38] sm:$0xff] }
  0x1d   :  { %681 = vmatprep.subr.mxu0 %v782_v0  ;;  %589 = vmatpush3.msra.mxu1 %v137_v48  ;;  %v458_v45 = vld [vmem:[%s1212_s8 + $0x40] sm:$0xff]  ;;  %v456_v47 = vld [vmem:[%s1212_s8 + $0x30] sm:$0xff]  ;;  %v455_v48 = vld [vmem:[%s1212_s8 + $0x28] sm:$0xff] }
  0x1e   :  { %682 = vmatpush3.msra.mxu0 %v175_v49  ;;  %590 = vmatprep.subr.mxu1 %v152_v50  ;;  %v454_v49 = vld [vmem:[%s1212_s8 + $0x20] sm:$0xff]  ;;  %v453_v50 = vld [vmem:[%s1212_s8 + $0x18] sm:$0xff] }
  0x1f   :  { %683 = vmatprep.subr.mxu0 %v782_v0  ;;  %591 = vmatpush3.msra.mxu1 %v136_v51  ;;  %v452_v51 = vld [vmem:[%s1212_s8 + $0x10] sm:$0xff] }
  0x20   :  { %684 = vmatpush3.msra.mxu0 %v174_v53  ;;  %592 = vmatprep.subr.mxu1 %v151_v54  ;;  %v450_v53 = vld [vmem:[%s1212_s8] sm:$0xff] }
  0x21   :  { %685 = vmatprep.subr.mxu0 %v782_v0  ;;  %593 = vmatpush3.msra.mxu1 %v135_v55  ;;  %v553_v54 = vld [vmem:[%s1214_s7] ss:$0 sm:$0xff] }
  0x22   :  { %686 = vmatpush3.msra.mxu0 %v173_v56  ;;  %594 = vmatprep.subr.mxu1 %v150_v57 }
  0x23   :  { %687 = vmatprep.subr.mxu0 %v782_v0  ;;  %595 = vmatpush3.msra.mxu1 %v134_v58 }
  0x24   :  { %688 = vmatpush3.msra.mxu0 %v172_v60  ;;  %273 = vmatprep.mubr.f32.mxu1 %v205_v59 }
  0x25   :  { %689 = vmatprep.subr.mxu0 %v782_v0  ;;  %274 = vmatmul.mubr.f32.vlgmr.msra.gmra.mxu1 %v197_v52  ;;  %v451_v52 = vld [vmem:[%s1212_s8 + $0x8] sm:$0xff] }
  0x26   :  { %690 = vmatpush3.msra.mxu0 %v171_v61  ;;  %701 = vmatprep.mubr.msk.f32.mxu0 %vm783_vm0, %v782_v0 }
  0x27   :  { %691 = vmatprep.subr.mxu0 %v782_v0  ;;  %704 = vmatprep.subr.mxu1 %v782_v0 }
  0x28   :  { %692 = vmatpush3.msra.mxu0 %v170_v62  ;;  %705 = vmatpush3.msra.mxu1 %v371_v63 }
  0x29   :  { %693 = vmatprep.subr.mxu0 %v782_v0  ;;  %706 = vmatprep.subr.mxu1 %v782_v0 }
  0x2a   :  { %694 = vmatpush3.msra.mxu0 %v169_v1  ;;  %707 = vmatpush3.msra.mxu1 %v370_v2  ;;  %v554_v2 = vld [vmem:[%s1215_s9] ss:$0 sm:$0xff] }
  0x2b   :  { %695 = vmatprep.subr.mxu0 %v782_v0  ;;  %708 = vmatprep.subr.mxu1 %v782_v0 }
  0x2c   :  { %696 = vmatpush3.msra.mxu0 %v168_v4  ;;  %709 = vmatpush3.msra.mxu1 %v369_v5 }
  0x2d   :  { %697 = vmatprep.subr.mxu0 %v782_v0  ;;  %710 = vmatprep.subr.mxu1 %v782_v0 }
  0x2e   :  { %698 = vmatpush3.msra.mxu0 %v167_v6  ;;  %711 = vmatpush3.msra.mxu1 %v368_v7 }
  0x2f   :  { %699 = vmatprep.subr.mxu0 %v782_v0  ;;  %712 = vmatprep.subr.mxu1 %v782_v0 }
  0x30   :  { %700 = vmatpush3.msra.mxu0 %v166_v9  ;;  %713 = vmatpush3.msra.mxu1 %v367_v10 }
  0x31   :  { %702 = vmatmul.mubr.f32.vlgmr.msra.gmra.mxu0 %v204_v8  ;;  %714 = vmatprep.subr.mxu1 %v782_v0 }
  0x32   :  { %715 = vmatpush3.msra.mxu1 %v366_v11  ;;  %736 = vmatprep.mubr.msk.f32.mxu1 %vm783_vm0, %v782_v0 }
  0x33   :  { %716 = vmatprep.subr.mxu1 %v782_v0  ;;  %739 = vmatprep.subr.mxu0 %v782_v0 }
  0x34   :  { %717 = vmatpush3.msra.mxu1 %v365_v12  ;;  %771 = vmatprep.mubr.msk.f32.mxu0 %vm783_vm0, %v782_v0 }
  0x35   :  { %718 = vmatprep.subr.mxu1 %v782_v0  ;;  %740 = vmatpush3.msra.mxu0 %v465_v28 }
  0x36   :  { %719 = vmatpush3.msra.mxu1 %v364_v13  ;;  %741 = vmatprep.subr.mxu0 %v782_v0 }
  0x37   :  { %720 = vmatprep.subr.mxu1 %v782_v0  ;;  %742 = vmatpush3.msra.mxu0 %v464_v29 }
  0x38   :  { %721 = vmatpush3.msra.mxu1 %v363_v14  ;;  %743 = vmatprep.subr.mxu0 %v782_v0 }
  0x39   :  { %722 = vmatprep.subr.mxu1 %v782_v0  ;;  %744 = vmatpush3.msra.mxu0 %v463_v31 }
  0x3a   :  { %723 = vmatpush3.msra.mxu1 %v362_v15  ;;  %745 = vmatprep.subr.mxu0 %v782_v0 }
  0x3b   :  { %724 = vmatprep.subr.mxu1 %v782_v0  ;;  %746 = vmatpush3.msra.mxu0 %v462_v33 }
  0x3c   :  { %725 = vmatpush3.msra.mxu1 %v361_v16  ;;  %747 = vmatprep.subr.mxu0 %v782_v0 }
  0x3d   :  { %726 = vmatprep.subr.mxu1 %v782_v0  ;;  %748 = vmatpush3.msra.mxu0 %v461_v42 }
  0x3e   :  { %727 = vmatpush3.msra.mxu1 %v360_v17  ;;  %749 = vmatprep.subr.mxu0 %v782_v0 }
  0x3f   :  { %728 = vmatprep.subr.mxu1 %v782_v0  ;;  %750 = vmatpush3.msra.mxu0 %v460_v43 }
  0x40   :  { %729 = vmatpush3.msra.mxu1 %v359_v18  ;;  %751 = vmatprep.subr.mxu0 %v782_v0 }
  0x41   :  { %730 = vmatprep.subr.mxu1 %v782_v0  ;;  %752 = vmatpush3.msra.mxu0 %v459_v44 }
  0x42   :  { %731 = vmatpush3.msra.mxu1 %v358_v19  ;;  %753 = vmatprep.subr.mxu0 %v782_v0 }
  0x43   :  { %732 = vmatprep.subr.mxu1 %v782_v0  ;;  %754 = vmatpush3.msra.mxu0 %v458_v45 }
  0x44   :  { %733 = vmatpush3.msra.mxu1 %v357_v20  ;;  %755 = vmatprep.subr.mxu0 %v782_v0 }
  0x45   :  { %734 = vmatprep.subr.mxu1 %v782_v0  ;;  %756 = vmatpush3.msra.mxu0 %v457_v46 }
  0x46   :  { %735 = vmatpush3.msra.mxu1 %v356_v21  ;;  %757 = vmatprep.subr.mxu0 %v782_v0 }
  0x47   :  { %758 = vmatpush3.msra.mxu0 %v456_v47 }
  0x48   :  { %759 = vmatprep.subr.mxu0 %v782_v0 }
  0x49   :  { %760 = vmatpush3.msra.mxu0 %v455_v48 }
  0x4a   :  { %761 = vmatprep.subr.mxu0 %v782_v0 }
  0x4b   :  { %762 = vmatpush3.msra.mxu0 %v454_v49 }
  0x4c   :  { %763 = vmatprep.subr.mxu0 %v782_v0 }
  0x4d   :  { %764 = vmatpush3.msra.mxu0 %v453_v50 }
  0x4e   :  { %765 = vmatprep.subr.mxu0 %v782_v0 }
  0x4f   :  { %766 = vmatpush3.msra.mxu0 %v452_v51 }
  0x50   :  { %767 = vmatprep.subr.mxu0 %v782_v0 }
  0x51   :  { %768 = vmatpush3.msra.mxu0 %v451_v52 }
  0x52   :  { %769 = vmatprep.subr.mxu0 %v782_v0 }
  0x53   :  { %770 = vmatpush3.msra.mxu0 %v450_v53 }
  0xd1   :  { %v121_v23 = vpop.f32.mrf.mxu0 }
  0xd2   :  { %v1123_v24 = vadd.f32 %v550_v22, %v121_v23 }
  0xd3   :  { %v668_v25 = vpop.f32.mrf.mxu0 }
  0xd4   :  { %737 = vmatmul.mubr.f32.vlgmr.msra.gmra.mxu1 %v1123_v24  ;;  %v125_v26 = vmul.f32 %v1123_v24, %v1123_v24 }
  0xd6   :  { %v127_v27 = vsel %vm126_vm2, %v125_v26, 0.0 }
  0xd7   :  { %128 = vadd.xlane.f32.xlu0 %v127_v27 }
  0xe5   :  { %v596_v30 = vpop.f32.mrf.mxu1 }
  0xe7   :  { %v597_v32 = vpop.f32.mrf.mxu1 }
  0xe8   :  { %v598_v34 = vadd.f32 %v597_v32, %v596_v30 }
  0xea   :  { %v276_v36 = vadd.f32 %v598_v34, %v552_v35 }
  0xf1   :  { %v345_v37 = vpop.f32.mrf.mxu0 }
  0xf2   :  { %v346_v38 = vadd.f32 %v345_v37, %v276_v36 }
  0xf3   :  { %v703_v39 = vpop.f32.mrf.mxu0 }
  0xf4   :  { %v349_v40 = vmul.f32 %v346_v38, %v346_v38 }
  0xf6   :  { %v350_v41 = vsel %vm126_vm2, %v349_v40, 0.0 }
  0xf7   :  { %351 = vadd.xlane.f32.xlu0 %v350_v41 }
 0x160   :  { %v129_v59 = vpop.xlane.xlu0 %128 }
 0x161   :  { %v130_v62 = vmax.f32 %v129_v59, 1e-24 }
 0x180   :  { %v352_v60 = vpop.xlane.xlu0 %351 }
 0x181   :  { %v353_v61 = vmax.f32 %v352_v60, 1e-24 }
 0x183   :  { %778 = vrsqrt.f32 %v353_v61 }
 0x184   :  { %780 = vrsqrt.f32 %v130_v62 }
 0x190   :  { %v779_v0 = vpop.eup %778 }
 0x191   :  { %v781_v63 = vpop.eup %780  ;;  %v355_v1 = vmul.f32 %v779_v0, %v346_v38 }
 0x192   :  { %v132_v3 = vmul.f32 %v781_v63, %v1123_v24 }
 0x194   :  { %v445_v55 = vpop.f32.mrf.mxu1  ;;  %v543_v6 = vadd.f32 %v355_v1, %v132_v3 }
 0x195   :  { %v446_v56 = vadd.f32 %v553_v54, %v445_v55 }
 0x196   :  { %v738_v57 = vpop.f32.mrf.mxu1 }
 0x197   :  { %v449_v58 = vmax.f32 %v446_v56, 0.0 }
 0x199   :  { %772 = vmatmul.mubr.f32.vlgmr.msra.gmra.mxu0 %v449_v58 }
 0x259   :  { %v539_v4 = vpop.f32.mrf.mxu0 }
 0x25a   :  { %v540_v5 = vadd.f32 %v554_v2, %v539_v4 }
 0x25b   :  { %v773_v7 = vpop.f32.mrf.mxu0 }
 0x25c   :  { %v544_v8 = vadd.f32 %v543_v6, %v540_v5 }
 0x25e   :  { %545 = vst [vmem:[%s1216_s10] sm:$0x3] %v544_v8 }

</bundles_post_ra>
